<compile_context>
chip_gen: v7x
topology: tpu7x:2x2x1
jax: 0.10.0
libtpu: 0.0.40
codegen_flags: <defaults>
</compile_context>

<pallas_src>
import functools

import jax
import jax.numpy as jnp
from jax import lax
from jax.experimental import pallas as pl
from jax.experimental.pallas import tpu as pltpu

KERNEL_SIZE = 3
PADDING = 1
STRIDE = 1  # FixedConv's reshape-back only makes sense for stride=1, 'same' padding.

_LANE = 128                              # TPU lane width
_VMEM_BLOCK_BUDGET = 12 * 1024 * 1024    # target bytes for the pipelined blocks
_VMEM_LIMIT_BYTES = 32 * 1024 * 1024     # explicit scoped-VMEM limit (safe on v5e/v6e/v7x)


def _fixed_conv_kernel(w_ref, b_ref, xp_ref, o_ref, *, ksize):
    """One grid step: (Hp, Wp, TB) padded slab -> (H, W, TB) output slab.

    w_ref: (k*k,) f32 in SMEM (flattened so SMEM padding stays tiny).
    b_ref: (1,) f32 in SMEM.
    xp_ref: (H+k-1, W+k-1, TB) VMEM block (zero halo already included).
    o_ref:  (H, W, TB) VMEM block.  TB (lane axis) is a multiple of 128.
    """
    H, W, TB = o_ref.shape
    # Hoist the k*k SMEM scalar loads ahead of the vector work.
    w = [w_ref[i] for i in range(ksize * ksize)]
    # Fold the bias into the accumulator init: one broadcast instead of a full
    # extra VPU add pass over the output slab at the end.
    acc = jnp.full((H, W, TB), b_ref[0], dtype=jnp.float32)
    # Unrolled k*k shift-and-MAC.  The (dy, dx) offsets land on the outer /
    # sublane axes (H / W); the lane axis (TB) is always a full aligned access.
    for dy in range(ksize):
        for dx in range(ksize):
            tap = xp_ref[dy:dy + H, dx:dx + W, :].astype(jnp.float32)
            acc = acc + w[dy * ksize + dx] * tap
    o_ref[...] = acc.astype(o_ref.dtype)


def _choose_lane_tile(nc, h, w, padding):
    """Pick (TB lanes per grid step, grid length, padded NC total)."""
    hp, wp = h + 2 * padding, w + 2 * padding
    # f32 bytes per lane of NC: double-buffered padded input block,
    # double-buffered output block, plus accumulator headroom.
    per_lane = 4 * (2 * hp * wp + 2 * h * w + h * w)
    max_tb = max(_LANE, (_VMEM_BLOCK_BUDGET // per_lane) // _LANE * _LANE)
    nc128 = pl.cdiv(nc, _LANE) * _LANE
    grid = pl.cdiv(nc128, max_tb)
    if nc128 >= 2 * _LANE:
        grid = max(grid, 2)          # keep both v7x TensorCores busy
    tb = pl.cdiv(nc128 // _LANE, grid) * _LANE
    grid = pl.cdiv(nc128, tb)
    return tb, grid, grid * tb


def fixed_conv(x, weight, bias, *, kernel_size=KERNEL_SIZE, padding=PADDING):
    """x: (N, C, H, W). weight: (k, k). bias: (1,). Returns (N, C, H, W)."""
    assert 2 * padding == kernel_size - 1, "reshape-back requires same-size output"
    N, C, H, W = x.shape
    NC = N * C
    Hp, Wp = H + 2 * padding, W + 2 * padding
    tb, grid, nc_total = _choose_lane_tile(NC, H, W, padding)

    # Lane-dense re-layout: (N, C, H, W) -> (Hp, Wp, nc_total) with NC on the
    # lane axis.  The zero halo and the NC round-up ride the same copy/fusion
    # as the transpose (layout plumbing, not a second full-tensor pass).
    xt = jnp.transpose(x.reshape(NC, H, W), (1, 2, 0))
    xt = jnp.pad(xt, ((padding, padding), (padding, padding), (0, nc_total - NC)))

    kernel = functools.partial(_fixed_conv_kernel, ksize=kernel_size)
    itemsize = x.dtype.itemsize
    out = pl.pallas_call(
        kernel,
        out_shape=jax.ShapeDtypeStruct((H, W, nc_total), x.dtype),
        grid=(grid,),
        in_specs=[
            pl.BlockSpec(memory_space=pltpu.MemorySpace.SMEM),   # weight (k*k,)
            pl.BlockSpec(memory_space=pltpu.MemorySpace.SMEM),   # bias (1,)
            pl.BlockSpec((Hp, Wp, tb), lambda i: (0, 0, i)),     # padded input slab
        ],
        out_specs=pl.BlockSpec((H, W, tb), lambda i: (0, 0, i)),
        compiler_params=pltpu.CompilerParams(
            dimension_semantics=("parallel",),
            vmem_limit_bytes=_VMEM_LIMIT_BYTES),
        cost_estimate=pl.CostEstimate(
            flops=2 * kernel_size * kernel_size * nc_total * H * W,
            transcendentals=0,
            bytes_accessed=(Hp * Wp + H * W) * nc_total * itemsize),
    )(weight.reshape(-1).astype(jnp.float32), bias.astype(jnp.float32), xt)

    out = jnp.transpose(out[:, :, :NC], (2, 0, 1)).reshape(N, C, H, W)
    return out


def _reference(x, weight, bias, *, padding=PADDING):
    # Pure-JAX reference: Conv2d(in=1, out=1) applied on (N*C, 1, H, W).
    N, C, H, W = x.shape
    xr = x.reshape(N * C, 1, H, W)
    w = weight.reshape(1, 1, KERNEL_SIZE, KERNEL_SIZE)
    y = lax.conv_general_dilated(
        xr, w, window_strides=(STRIDE, STRIDE),
        padding=[(padding, padding), (padding, padding)],
        dimension_numbers=("NCHW", "OIHW", "NCHW"))
    y = y + bias.reshape(1, 1, 1, 1)
    return y.reshape(x.shape)


if __name__ == "__main__":
    key = jax.random.PRNGKey(0)
    kx, kw, kb = jax.random.split(key, 3)

    # Small deterministic shapes consistent with the module's forward.
    N, C, H, W = 2, 4, 16, 16
    x = jax.random.normal(kx, (N, C, H, W), dtype=jnp.float32)

    # Deterministic Conv2d(1, 1, 3, padding=1) parameters:
    # PyTorch weight shape (1, 1, 3, 3) -> flattened to (3, 3); bias (1,).
    fan_in = 1 * KERNEL_SIZE * KERNEL_SIZE
    bound = 1.0 / jnp.sqrt(fan_in)
    weight = jax.random.uniform(kw, (KERNEL_SIZE, KERNEL_SIZE),
                                minval=-bound, maxval=bound,
                                dtype=jnp.float32)
    bias = jax.random.uniform(kb, (1,), minval=-bound, maxval=bound,
                              dtype=jnp.float32)

    out = fixed_conv(x, weight, bias)
    out = jax.block_until_ready(out)

    ref = _reference(x, weight, bias)
    assert out.shape == x.shape
    assert jnp.allclose(out, ref, atol=1e-5, rtol=1e-5), "mismatch vs reference"

    print("KERNEL_OK")
</pallas_src>

<mosaic_0001>
module attributes {stable_mosaic.version = 11 : i64} {
  func.func @_fixed_conv_kernel(%arg0: i32, %arg1: memref<9xf32, #tpu.memory_space<smem>>, %arg2: memref<1xf32, #tpu.memory_space<smem>>, %arg3: memref<18x18x128xf32, #tpu.memory_space<vmem>>, %arg4: memref<16x16x128xf32, #tpu.memory_space<vmem>>) attributes {dimension_semantics = [#tpu.dimension_semantics<parallel>], iteration_bounds = array<i64: 1>, scalar_prefetch = 0 : i64, scratch_operands = 0 : i64, tpu.core_type = #tpu.core_type<tc>, window_params = [{transform_indices = @transform_0, window_bounds = array<i64: 9>}, {transform_indices = @transform_1, window_bounds = array<i64: 1>}, {transform_indices = @transform_2, window_bounds = array<i64: 18, 18, 128>}, {transform_indices = @transform_3, window_bounds = array<i64: 16, 16, 128>}]} {
    %c0 = arith.constant 0 : index
    %0 = memref.load %arg1[%c0] : memref<9xf32, #tpu.memory_space<smem>>
    %c1 = arith.constant 1 : index
    %1 = memref.load %arg1[%c1] : memref<9xf32, #tpu.memory_space<smem>>
    %c2 = arith.constant 2 : index
    %2 = memref.load %arg1[%c2] : memref<9xf32, #tpu.memory_space<smem>>
    %c3 = arith.constant 3 : index
    %3 = memref.load %arg1[%c3] : memref<9xf32, #tpu.memory_space<smem>>
    %c4 = arith.constant 4 : index
    %4 = memref.load %arg1[%c4] : memref<9xf32, #tpu.memory_space<smem>>
    %c5 = arith.constant 5 : index
    %5 = memref.load %arg1[%c5] : memref<9xf32, #tpu.memory_space<smem>>
    %c6 = arith.constant 6 : index
    %6 = memref.load %arg1[%c6] : memref<9xf32, #tpu.memory_space<smem>>
    %c7 = arith.constant 7 : index
    %7 = memref.load %arg1[%c7] : memref<9xf32, #tpu.memory_space<smem>>
    %c8 = arith.constant 8 : index
    %8 = memref.load %arg1[%c8] : memref<9xf32, #tpu.memory_space<smem>>
    %c0_0 = arith.constant 0 : index
    %9 = memref.load %arg2[%c0_0] : memref<1xf32, #tpu.memory_space<smem>>
    %10 = vector.broadcast %9 : f32 to vector<16x16x128xf32>
    %c0_1 = arith.constant 0 : index
    %c0_2 = arith.constant 0 : index
    %c0_3 = arith.constant 0 : index
    %11 = vector.load %arg3[%c0_1, %c0_2, %c0_3] : memref<18x18x128xf32, #tpu.memory_space<vmem>>, vector<16x16x128xf32>
    %12 = vector.broadcast %0 : f32 to vector<16x16x128xf32>
    %13 = arith.mulf %12, %11 : vector<16x16x128xf32>
    %14 = arith.addf %10, %13 : vector<16x16x128xf32>
    %c0_4 = arith.constant 0 : index
    %c1_5 = arith.constant 1 : index
    %c0_6 = arith.constant 0 : index
    %15 = vector.load %arg3[%c0_4, %c1_5, %c0_6] : memref<18x18x128xf32, #tpu.memory_space<vmem>>, vector<16x16x128xf32>
    %16 = vector.broadcast %1 : f32 to vector<16x16x128xf32>
    %17 = arith.mulf %16, %15 : vector<16x16x128xf32>
    %18 = arith.addf %14, %17 : vector<16x16x128xf32>
    %c0_7 = arith.constant 0 : index
    %c2_8 = arith.constant 2 : index
    %c0_9 = arith.constant 0 : index
    %19 = vector.load %arg3[%c0_7, %c2_8, %c0_9] : memref<18x18x128xf32, #tpu.memory_space<vmem>>, vector<16x16x128xf32>
    %20 = vector.broadcast %2 : f32 to vector<16x16x128xf32>
    %21 = arith.mulf %20, %19 : vector<16x16x128xf32>
    %22 = arith.addf %18, %21 : vector<16x16x128xf32>
    %c1_10 = arith.constant 1 : index
    %c0_11 = arith.constant 0 : index
    %c0_12 = arith.constant 0 : index
    %23 = vector.load %arg3[%c1_10, %c0_11, %c0_12] : memref<18x18x128xf32, #tpu.memory_space<vmem>>, vector<16x16x128xf32>
    %24 = vector.broadcast %3 : f32 to vector<16x16x128xf32>
    %25 = arith.mulf %24, %23 : vector<16x16x128xf32>
    %26 = arith.addf %22, %25 : vector<16x16x128xf32>
    %c1_13 = arith.constant 1 : index
    %c1_14 = arith.constant 1 : index
    %c0_15 = arith.constant 0 : index
    %27 = vector.load %arg3[%c1_13, %c1_14, %c0_15] : memref<18x18x128xf32, #tpu.memory_space<vmem>>, vector<16x16x128xf32>
    %28 = vector.broadcast %4 : f32 to vector<16x16x128xf32>
    %29 = arith.mulf %28, %27 : vector<16x16x128xf32>
    %30 = arith.addf %26, %29 : vector<16x16x128xf32>
    %c1_16 = arith.constant 1 : index
    %c2_17 = arith.constant 2 : index
    %c0_18 = arith.constant 0 : index
    %31 = vector.load %arg3[%c1_16, %c2_17, %c0_18] : memref<18x18x128xf32, #tpu.memory_space<vmem>>, vector<16x16x128xf32>
    %32 = vector.broadcast %5 : f32 to vector<16x16x128xf32>
    %33 = arith.mulf %32, %31 : vector<16x16x128xf32>
    %34 = arith.addf %30, %33 : vector<16x16x128xf32>
    %c2_19 = arith.constant 2 : index
    %c0_20 = arith.constant 0 : index
    %c0_21 = arith.constant 0 : index
    %35 = vector.load %arg3[%c2_19, %c0_20, %c0_21] : memref<18x18x128xf32, #tpu.memory_space<vmem>>, vector<16x16x128xf32>
    %36 = vector.broadcast %6 : f32 to vector<16x16x128xf32>
    %37 = arith.mulf %36, %35 : vector<16x16x128xf32>
    %38 = arith.addf %34, %37 : vector<16x16x128xf32>
    %c2_22 = arith.constant 2 : index
    %c1_23 = arith.constant 1 : index
    %c0_24 = arith.constant 0 : index
    %39 = vector.load %arg3[%c2_22, %c1_23, %c0_24] : memref<18x18x128xf32, #tpu.memory_space<vmem>>, vector<16x16x128xf32>
    %40 = vector.broadcast %7 : f32 to vector<16x16x128xf32>
    %41 = arith.mulf %40, %39 : vector<16x16x128xf32>
    %42 = arith.addf %38, %41 : vector<16x16x128xf32>
    %c2_25 = arith.constant 2 : index
    %c2_26 = arith.constant 2 : index
    %c0_27 = arith.constant 0 : index
    %43 = vector.load %arg3[%c2_25, %c2_26, %c0_27] : memref<18x18x128xf32, #tpu.memory_space<vmem>>, vector<16x16x128xf32>
    %44 = vector.broadcast %8 : f32 to vector<16x16x128xf32>
    %45 = arith.mulf %44, %43 : vector<16x16x128xf32>
    %46 = arith.addf %42, %45 : vector<16x16x128xf32>
    %c0_28 = arith.constant 0 : index
    %c0_29 = arith.constant 0 : index
    %c0_30 = arith.constant 0 : index
    %47 = vector.load %arg4[%c0_28, %c0_29, %c0_30] : memref<16x16x128xf32, #tpu.memory_space<vmem>>, vector<16x16x128xf32>
    tpu.vector_store %arg4[%c0_28, %c0_29, %c0_30], %46 {strides = array<i32>} : memref<16x16x128xf32, #tpu.memory_space<vmem>>, vector<16x16x128xf32>,
    return
  }
  func.func @transform_0(%arg0: i32) -> i32 {
    %c0_i32 = arith.constant 0 : i32
    %c0_i32_0 = arith.constant 0 : i32
    return %c0_i32 : i32
  }
  func.func @transform_1(%arg0: i32) -> i32 {
    %c0_i32 = arith.constant 0 : i32
    %c0_i32_0 = arith.constant 0 : i32
    return %c0_i32 : i32
  }
  func.func @transform_2(%arg0: i32) -> (i32, i32, i32) {
    %c0_i32 = arith.constant 0 : i32
    %c0_i32_0 = arith.constant 0 : i32
    %c0_i32_1 = arith.constant 0 : i32
    return %c0_i32, %c0_i32_0, %arg0 : i32, i32, i32
  }
  func.func @transform_3(%arg0: i32) -> (i32, i32, i32) {
    %c0_i32 = arith.constant 0 : i32
    %c0_i32_0 = arith.constant 0 : i32
    %c0_i32_1 = arith.constant 0 : i32
    return %c0_i32, %c0_i32_0, %arg0 : i32, i32, i32
  }
}

</mosaic_0001>

<bundles_post_ra>
// kernel: tpu_custom_call.1
= control target key start
LH: loop header
LB: loop body
LE: loop exit
PB: predicated region body
PF: predicated region fallthrough
CT: control target
= control target key end

     0   :  { %9 = vsyncpa [#allocation6], 0  ;;  %s1455_s0 = inlined_call_operand.vmem [shape: f32[9], index: 0, kind: input, shape index: {}]   ;;  %s1456_s1 = inlined_call_operand.<no memory space> [shape: f32[1], index: 1, kind: input, shape index: {}]   ;;  %s1457_s2 = inlined_call_operand.hbm [shape: f32[18,18,128], index: 2, kind: input, shape index: {}]   ;;  %s1458_s3 = inlined_call_operand.hbm [shape: f32[16,16,128], index: 3, kind: output, shape index: {}]  }
   0x1   :  { %10 = vsyncpa [#allocation4], 0 }
   0x2   :  { %11 = vsyncpa [#allocation5], 0  ;;  %s18_s14 = sshll.u32 %s1455_s0, 4  ;;  %s19_s14 = int_to_ptr.vmem [resolvable:$true] %s18_s14 }
   0x3   :  { %s992_s15 = scalar_lea.vmem %s19_s14, 16  ;;  %p997_p1 = scmp.lt.s32.totalorder %s19_s14, %s19_s14 }
   0x4   :  { %p993_p0 = scmp.ne.s32.totalorder %s19_s14, %s992_s15  ;;  %p998_p2 = scmp.lt.s32.totalorder %s992_s15, %s992_s15 }
   0x6   :  { %p999_p3 = por %p998_p2, %p997_p1 }
   0x8   :  { %p1000_p4 = pnand %p999_p3, %p993_p0 }
   0xa   :  { %1003 = shalt.err (!%p1000_p4)
}
   0xb   :  { %s1054_s16 = smov [#allocation3]   ;;  %s1055_s17 = smov [#allocation7]  }
   0xc   :  { %21 = dma.vmem_to_smem %s19_s14, 16, %s1054_s16, [#allocation6]  }
   0xd   :  { %s29_s18 = sshll.u32 %s1055_s17, 4  ;;  %s1004_s21 = scalar_lea.hbm %s1457_s2, 6912  ;;  %s30_s18 = int_to_ptr.vmem [resolvable:$true] %s29_s18 }
   0xe   :  { %p1005_p5 = scmp.ne.s32.totalorder %s1457_s2, %s1004_s21  ;;  %p1008_p6 = scmp.lt.u32.totalorder %s1004_s21, %s1457_s2 }
  0x10   :  { %p1010_p7 = pnand %p1008_p6, %p1005_p5 }
  0x12   :  { %1013 = shalt.err (!%p1010_p7)
}
  0x13   :  { %s1014_s25 = scalar_lea.vmem %s30_s18, 6912  ;;  %p1019_p9 = scmp.lt.s32.totalorder %s30_s18, %s30_s18 }
  0x14   :  { %p1015_p8 = scmp.ne.s32.totalorder %s30_s18, %s1014_s25  ;;  %p1020_p10 = scmp.lt.s32.totalorder %s1014_s25, %s1014_s25 }
  0x16   :  { %p1021_p11 = por %p1020_p10, %p1019_p9 }
  0x18   :  { %p1022_p12 = pnand %p1021_p11, %p1015_p8 }
  0x1a   :  { %1025 = shalt.err (!%p1022_p12)
}
  0x1b   :  { %s1056_s26 = smov 128   ;;  %s1057_s27 = smov 8  }
  0x1c   :  { %35 = dma.hbm_to_vmem [thread:$0]  %s1457_s2, 6912, %s30_s18, [#allocation4], %s1056_s26, %s1056_s26, %s1057_s27  }
  0x1d   :  { %1048 = dma.done.wait [#allocation6], 16  }
  0x1e   :  { %1049 = vsyncadd [#allocation6], 4294967280 }
  0x1f   :  { %1050 = dma.done.wait [#allocation4], 6912  }
  0x20   :  { %1051 = vsyncadd [#allocation4], 4294960384 }
  0x21   :  { %42 = sfence }
  0x22   :  { %s43_s30 = sld [smem:[#allocation3]]  ;;  %s979_s4 = sld [smem:[#allocation3 + $0x1]]  ;;  %v54_v0 = vld [vmem:[#allocation7] sm:$0xff]  ;;  %v1100_v2 = vstv %s1456_s1  ;;  %v55_v9 = vld [vmem:[#allocation7 + $0x8] sm:$0xff]  ;;  %v346_v15 = vld [vmem:[#allocation7 + $0x18] sm:$0xff] }
  0x23   :  { %s980_s5 = sld [smem:[#allocation3 + $0x2]]  ;;  %s981_s6 = sld [smem:[#allocation3 + $0x3]]  ;;  %v151_v1 = vld [vmem:[#allocation7 + $0x1] sm:$0xff]  ;;  %v152_v11 = vld [vmem:[#allocation7 + $0x9] sm:$0xff]  ;;  %v443_v22 = vld [vmem:[#allocation7 + $0x19] sm:$0xff] }
  0x24   :  { %s982_s7 = sld [smem:[#allocation3 + $0x4]]  ;;  %s983_s8 = sld [smem:[#allocation3 + $0x5]]  ;;  %v248_v5 = vld [vmem:[#allocation7 + $0x2] sm:$0xff]  ;;  %v249_v14 = vld [vmem:[#allocation7 + $0xa] sm:$0xff]  ;;  %v540_v24 = vld [vmem:[#allocation7 + $0x1a] sm:$0xff] }
  0x25   :  { %s984_s9 = sld [smem:[#allocation3 + $0x6]]  ;;  %s985_s10 = sld [smem:[#allocation3 + $0x7]]  ;;  %v638_v25 = vld [vmem:[#allocation7 + $0x30] sm:$0xff]  ;;  %v347_v34 = vld [vmem:[#allocation7 + $0x20] sm:$0xff]  ;;  %v639_v49 = vld [vmem:[#allocation7 + $0x38] sm:$0xff] }
  0x26   :  { %s986_s11 = sld [smem:[#allocation3 + $0x8]]  ;;  %v735_v35 = vld [vmem:[#allocation7 + $0x31] sm:$0xff]  ;;  %v444_v39 = vld [vmem:[#allocation7 + $0x21] sm:$0xff]  ;;  %v736_v50 = vld [vmem:[#allocation7 + $0x39] sm:$0xff]  ;;  %s1058_s1 = smov [#allocation8]  }
  0x27   :  { %v832_v36 = vld [vmem:[#allocation7 + $0x32] sm:$0xff]  ;;  %v541_v46 = vld [vmem:[#allocation7 + $0x22] sm:$0xff]  ;;  %v833_v58 = vld [vmem:[#allocation7 + $0x3a] sm:$0xff]  ;;  %s966_s2 = sshll.u32 %s1058_s1, 4  ;;  %s967_s2 = int_to_ptr.vmem [resolvable:$true] %s966_s2 }
  0x28   :  { %v1102_v3 = vstv %s43_s30  ;;  %v1104_v4 = vstv %s979_s4  ;;  %s1026_s14 = scalar_lea.vmem %s967_s2, 4096  ;;  %p1031_p0 = scmp.lt.s32.totalorder %s967_s2, %s967_s2 }
  0x29   :  { %v87_v6 = vmul.f32 %v1102_v3, %v54_v0  ;;  %v184_v7 = vmul.f32 %v1104_v4, %v151_v1  ;;  %v1108_v8 = vstv %s980_s5  ;;  %v1110_v10 = vstv %s981_s6  ;;  %p1027_p13 = scmp.ne.s32.totalorder %s967_s2, %s1026_s14  ;;  %p1032_p1 = scmp.lt.s32.totalorder %s1026_s14, %s1026_s14 }
  0x2a   :  { %v281_v13 = vmul.f32 %v1108_v8, %v248_v5  ;;  %v1114_v16 = vstv %s982_s7  ;;  %v1116_v17 = vstv %s983_s8  ;;  %v88_v19 = vmul.f32 %v1102_v3, %v55_v9 }
  0x2b   :  { %v119_v12 = vadd.f32 %v87_v6, %v1100_v2  ;;  %v1118_v18 = vstv %s984_s9  ;;  %v379_v21 = vmul.f32 %v1110_v10, %v346_v15  ;;  %v185_v23 = vmul.f32 %v1104_v4, %v152_v11  ;;  %v640_v11 = vld [vmem:[#allocation7 + $0x48] sm:$0xff]  ;;  %p1033_p2 = por %p1032_p1, %p1031_p0 }
  0x2c   :  { %v1123_v26 = vstv %s985_s10  ;;  %v1125_v27 = vstv %s986_s11  ;;  %v120_v28 = vadd.f32 %v88_v19, %v1100_v2  ;;  %v282_v29 = vmul.f32 %v1108_v8, %v249_v14 }
  0x2d   :  { %v216_v20 = vadd.f32 %v184_v7, %v119_v12  ;;  %v476_v31 = vmul.f32 %v1114_v16, %v443_v22  ;;  %v573_v32 = vmul.f32 %v1116_v17, %v540_v24  ;;  %v671_v33 = vmul.f32 %v1118_v18, %v638_v25  ;;  %p1034_p3 = pnand %p1033_p2, %p1027_p13 }
  0x2e   :  { %v217_v37 = vadd.f32 %v185_v23, %v120_v28  ;;  %v380_v38 = vmul.f32 %v1110_v10, %v347_v34  ;;  %v89_v40 = vmul.f32 %v346_v15, %v1102_v3  ;;  %v186_v41 = vmul.f32 %v443_v22, %v1104_v4 }
  0x2f   :  { %v313_v30 = vadd.f32 %v281_v13, %v216_v20  ;;  %v768_v43 = vmul.f32 %v1123_v26, %v735_v35  ;;  %v865_v44 = vmul.f32 %v1125_v27, %v832_v36  ;;  %v477_v45 = vmul.f32 %v1114_v16, %v444_v39 }
  0x30   :  { %v314_v47 = vadd.f32 %v282_v29, %v217_v37  ;;  %v574_v48 = vmul.f32 %v1116_v17, %v541_v46  ;;  %v121_v51 = vadd.f32 %v89_v40, %v1100_v2  ;;  %v283_v52 = vmul.f32 %v540_v24, %v1108_v8 }
  0x31   :  { %v411_v42 = vadd.f32 %v379_v21, %v313_v30  ;;  %v672_v54 = vmul.f32 %v1118_v18, %v639_v49  ;;  %v769_v55 = vmul.f32 %v1123_v26, %v736_v50  ;;  %v90_v56 = vmul.f32 %v347_v34, %v1102_v3  ;;  %v737_v21 = vld [vmem:[#allocation7 + $0x49] sm:$0xff] }
  0x32   :  { %v412_v57 = vadd.f32 %v380_v38, %v314_v47  ;;  %v218_v59 = vadd.f32 %v186_v41, %v121_v51  ;;  %v381_v60 = vmul.f32 %v638_v25, %v1110_v10  ;;  %v187_v61 = vmul.f32 %v444_v39, %v1104_v4 }
  0x33   :  { %v508_v53 = vadd.f32 %v476_v31, %v411_v42  ;;  %v866_v63 = vmul.f32 %v1125_v27, %v833_v58  ;;  %v122_v0 = vadd.f32 %v90_v56, %v1100_v2  ;;  %v284_v1 = vmul.f32 %v541_v46, %v1108_v8  ;;  %v641_v42 = vld [vmem:[#allocation7 + $0x50] sm:$0xff] }
  0x34   :  { %v509_v5 = vadd.f32 %v477_v45, %v412_v57  ;;  %v315_v6 = vadd.f32 %v283_v52, %v218_v59  ;;  %v478_v7 = vmul.f32 %v735_v35, %v1114_v16  ;;  %v575_v9 = vmul.f32 %v832_v36, %v1116_v17  ;;  %v738_v52 = vld [vmem:[#allocation7 + $0x51] sm:$0xff] }
  0x35   :  { %v605_v62 = vadd.f32 %v573_v32, %v508_v53  ;;  %v673_v13 = vmul.f32 %v1118_v18, %v640_v11  ;;  %v219_v14 = vadd.f32 %v187_v61, %v122_v0  ;;  %v382_v15 = vmul.f32 %v639_v49, %v1110_v10  ;;  %v835_v57 = vld [vmem:[#allocation7 + $0x52] sm:$0xff] }
  0x36   :  { %v606_v19 = vadd.f32 %v574_v48, %v509_v5  ;;  %v413_v20 = vadd.f32 %v381_v60, %v315_v6  ;;  %v91_v22 = vmul.f32 %v638_v25, %v1102_v3  ;;  %v188_v23 = vmul.f32 %v735_v35, %v1104_v4 }
  0x37   :  { %v703_v12 = vadd.f32 %v671_v33, %v605_v62  ;;  %v770_v28 = vmul.f32 %v1123_v26, %v737_v21  ;;  %v316_v29 = vadd.f32 %v284_v1, %v219_v14  ;;  %v479_v30 = vmul.f32 %v736_v50, %v1114_v16  ;;  %v834_v33 = vld [vmem:[#allocation7 + $0x4a] sm:$0xff] }
  0x38   :  { %v704_v31 = vadd.f32 %v672_v54, %v606_v19  ;;  %v510_v32 = vadd.f32 %v478_v7, %v413_v20  ;;  %v123_v34 = vadd.f32 %v91_v22, %v1100_v2  ;;  %v285_v37 = vmul.f32 %v832_v36, %v1108_v8  ;;  %v836_v19 = vld [vmem:[#allocation7 + $0x62] sm:$0xff] }
  0x39   :  { %v800_v24 = vadd.f32 %v768_v43, %v703_v12  ;;  %v867_v39 = vmul.f32 %v1125_v27, %v834_v33  ;;  %v414_v40 = vadd.f32 %v382_v15, %v316_v29  ;;  %v576_v25 = vmul.f32 %v833_v58, %v1116_v17  ;;  %v739_v12 = vld [vmem:[#allocation7 + $0x61] sm:$0xff] }
  0x3a   :  { %v801_v35 = vadd.f32 %v769_v55, %v704_v31  ;;  %v607_v41 = vadd.f32 %v575_v9, %v510_v32  ;;  %v220_v43 = vadd.f32 %v188_v23, %v123_v34  ;;  %v383_v45 = vmul.f32 %v640_v11, %v1110_v10 }
  0x3b   :  { %v897_v38 = vadd.f32 %v865_v44, %v800_v24  ;;  %v511_v46 = vadd.f32 %v479_v30, %v414_v40  ;;  %v674_v47 = vmul.f32 %v1118_v18, %v641_v42  ;;  %v92_v48 = vmul.f32 %v639_v49, %v1102_v3 }
  0x3c   :  { %v189_v36 = vmul.f32 %v736_v50, %v1104_v4  ;;  %v898_v44 = vadd.f32 %v866_v63, %v801_v35  ;;  %v705_v51 = vadd.f32 %v673_v13, %v607_v41  ;;  %v317_v53 = vadd.f32 %v285_v37, %v220_v43  ;;  %v642_v63 = vld [vmem:[#allocation7 + $0x60] sm:$0xff]  ;;  %v740_v37 = vld [vmem:[#allocation7 + $0x69] sm:$0xff] }
  0x3d   :  { %929 = vst [vmem:[#allocation8] sm:$0xff] %v897_v38  ;;  %v480_v54 = vmul.f32 %v737_v21, %v1114_v16  ;;  %v608_v55 = vadd.f32 %v576_v25, %v511_v46  ;;  %v771_v56 = vmul.f32 %v1123_v26, %v738_v52  ;;  %v124_v59 = vadd.f32 %v92_v48, %v1100_v2 }
  0x3e   :  { %v286_v60 = vmul.f32 %v833_v58, %v1108_v8  ;;  %930 = vst [vmem:[#allocation8 + $0x8] sm:$0xff] %v898_v44  ;;  %v802_v61 = vadd.f32 %v770_v28, %v705_v51  ;;  %v868_v49 = vmul.f32 %v1125_v27, %v835_v57  ;;  %v415_v62 = vadd.f32 %v383_v45, %v317_v53  ;;  %v643_v28 = vld [vmem:[#allocation7 + $0x68] sm:$0xff] }
  0x3f   :  { %v577_v50 = vmul.f32 %v834_v33, %v1116_v17  ;;  %v706_v0 = vadd.f32 %v674_v47, %v608_v55  ;;  %v675_v1 = vmul.f32 %v1118_v18, %v642_v63  ;;  %v221_v5 = vadd.f32 %v189_v36, %v124_v59  ;;  %v837_v45 = vld [vmem:[#allocation7 + $0x6a] sm:$0xff]  ;;  %v644_v47 = vld [vmem:[#allocation7 + $0x78] sm:$0xff] }
  0x40   :  { %v384_v6 = vmul.f32 %v641_v42, %v1110_v10  ;;  %v899_v7 = vadd.f32 %v867_v39, %v802_v61  ;;  %v512_v9 = vadd.f32 %v480_v54, %v415_v62  ;;  %v93_v13 = vmul.f32 %v640_v11, %v1102_v3 }
  0x41   :  { %v190_v58 = vmul.f32 %v737_v21, %v1104_v4  ;;  %v803_v14 = vadd.f32 %v771_v56, %v706_v0  ;;  %v772_v15 = vmul.f32 %v1123_v26, %v739_v12  ;;  %v318_v20 = vadd.f32 %v286_v60, %v221_v5  ;;  %v741_v56 = vld [vmem:[#allocation7 + $0x79] sm:$0xff] }
  0x42   :  { %v481_v22 = vmul.f32 %v738_v52, %v1114_v16  ;;  %931 = vst [vmem:[#allocation8 + $0x10] sm:$0xff] %v899_v7  ;;  %v609_v23 = vadd.f32 %v577_v50, %v512_v9  ;;  %v869_v24 = vmul.f32 %v1125_v27, %v836_v19  ;;  %v125_v29 = vadd.f32 %v93_v13, %v1100_v2  ;;  %v645_v9 = vld [vmem:[#allocation7 + $0x80] sm:$0xff] }
  0x43   :  { %v287_v30 = vmul.f32 %v834_v33, %v1108_v8  ;;  %v900_v31 = vadd.f32 %v868_v49, %v803_v14  ;;  %v416_v11 = vadd.f32 %v384_v6, %v318_v20  ;;  %v578_v21 = vmul.f32 %v835_v57, %v1116_v17  ;;  %v838_v49 = vld [vmem:[#allocation7 + $0x7a] sm:$0xff] }
  0x44   :  { %v676_v32 = vmul.f32 %v1118_v18, %v643_v28  ;;  %v707_v34 = vadd.f32 %v675_v1, %v609_v23  ;;  %v222_v38 = vadd.f32 %v190_v58, %v125_v29  ;;  %v385_v39 = vmul.f32 %v642_v63, %v1110_v10  ;;  %v839_v23 = vld [vmem:[#allocation7 + $0x82] sm:$0xff] }
  0x45   :  { %v94_v40 = vmul.f32 %v641_v42, %v1102_v3  ;;  %932 = vst [vmem:[#allocation8 + $0x18] sm:$0xff] %v900_v31  ;;  %v513_v25 = vadd.f32 %v481_v22, %v416_v11  ;;  %v773_v35 = vmul.f32 %v1123_v26, %v740_v37  ;;  %v482_v41 = vmul.f32 %v739_v12, %v1114_v16  ;;  %v742_v22 = vld [vmem:[#allocation7 + $0x81] sm:$0xff] }
  0x46   :  { %v191_v33 = vmul.f32 %v738_v52, %v1104_v4  ;;  %v804_v43 = vadd.f32 %v772_v15, %v707_v34  ;;  %v319_v46 = vadd.f32 %v287_v30, %v222_v38  ;;  %v288_v36 = vmul.f32 %v835_v57, %v1108_v8  ;;  %v646_v38 = vld [vmem:[#allocation7 + $0x90] sm:$0xff] }
  0x47   :  { %v126_v48 = vadd.f32 %v94_v40, %v1100_v2  ;;  %v610_v44 = vadd.f32 %v578_v21, %v513_v25  ;;  %v870_v51 = vmul.f32 %v1125_v27, %v837_v45  ;;  %v579_v42 = vmul.f32 %v836_v19, %v1116_v17 }
  0x48   :  { %v677_v53 = vmul.f32 %v1118_v18, %v644_v47  ;;  %v901_v54 = vadd.f32 %v869_v24, %v804_v43  ;;  %v417_v55 = vadd.f32 %v385_v39, %v319_v46  ;;  %v386_v52 = vmul.f32 %v643_v28, %v1110_v10 }
  0x49   :  { %v223_v59 = vadd.f32 %v191_v33, %v126_v48  ;;  %v708_v60 = vadd.f32 %v676_v32, %v610_v44  ;;  %v774_v61 = vmul.f32 %v1123_v26, %v741_v56  ;;  %v95_v62 = vmul.f32 %v642_v63, %v1102_v3 }
  0x4a   :  { %v192_v57 = vmul.f32 %v739_v12, %v1104_v4  ;;  %933 = vst [vmem:[#allocation8 + $0x20] sm:$0xff] %v901_v54  ;;  %v514_v50 = vadd.f32 %v482_v41, %v417_v55  ;;  %v871_v0 = vmul.f32 %v1125_v27, %v838_v49  ;;  %v483_v5 = vmul.f32 %v740_v37, %v1114_v16 }
  0x4b   :  { %v320_v1 = vadd.f32 %v288_v36, %v223_v59  ;;  %v805_v6 = vadd.f32 %v773_v35, %v708_v60  ;;  %v580_v7 = vmul.f32 %v837_v45, %v1116_v17  ;;  %v127_v13 = vadd.f32 %v95_v62, %v1100_v2 }
  0x4c   :  { %v289_v58 = vmul.f32 %v836_v19, %v1108_v8  ;;  %v611_v14 = vadd.f32 %v579_v42, %v514_v50  ;;  %v678_v63 = vmul.f32 %v1118_v18, %v645_v9  ;;  %v387_v12 = vmul.f32 %v644_v47, %v1110_v10  ;;  %v647_v50 = vld [vmem:[#allocation7 + $0x98] sm:$0xff] }
  0x4d   :  { %v418_v15 = vadd.f32 %v386_v52, %v320_v1  ;;  %v902_v20 = vadd.f32 %v870_v51, %v805_v6  ;;  %v224_v24 = vadd.f32 %v192_v57, %v127_v13  ;;  %v96_v29 = vmul.f32 %v643_v28, %v1102_v3 }
  0x4e   :  { %v193_v30 = vmul.f32 %v740_v37, %v1104_v4  ;;  %v709_v31 = vadd.f32 %v677_v53, %v611_v14  ;;  %v775_v21 = vmul.f32 %v1123_v26, %v742_v22  ;;  %v872_v19 = vmul.f32 %v1125_v27, %v839_v23  ;;  %v840_v53 = vld [vmem:[#allocation7 + $0x92] sm:$0xff]  ;;  %v841_v14 = vld [vmem:[#allocation7 + $0x9a] sm:$0xff] }
  0x4f   :  { %v515_v11 = vadd.f32 %v483_v5, %v418_v15  ;;  %934 = vst [vmem:[#allocation8 + $0x28] sm:$0xff] %v902_v20  ;;  %v321_v32 = vadd.f32 %v289_v58, %v224_v24  ;;  %v484_v34 = vmul.f32 %v741_v56, %v1114_v16  ;;  %v128_v39 = vadd.f32 %v96_v29, %v1100_v2  ;;  %v744_v58 = vld [vmem:[#allocation7 + $0x99] sm:$0xff] }
  0x50   :  { %v290_v40 = vmul.f32 %v837_v45, %v1108_v8  ;;  %v806_v25 = vadd.f32 %v774_v61, %v709_v31  ;;  %v581_v28 = vmul.f32 %v838_v49, %v1116_v17  ;;  %v679_v37 = vmul.f32 %v1118_v18, %v646_v38  ;;  %v743_v45 = vld [vmem:[#allocation7 + $0x91] sm:$0xff] }
  0x51   :  { %v612_v35 = vadd.f32 %v580_v7, %v515_v11  ;;  %v419_v41 = vadd.f32 %v387_v12, %v321_v32  ;;  %v225_v33 = vadd.f32 %v193_v30, %v128_v39  ;;  %v388_v43 = vmul.f32 %v645_v9, %v1110_v10  ;;  %v648_v11 = vld [vmem:[#allocation7 + $0xa8] sm:$0xff] }
  0x52   :  { %v97_v46 = vmul.f32 %v644_v47, %v1102_v3  ;;  %v903_v48 = vadd.f32 %v871_v0, %v806_v25  ;;  %v485_v44 = vmul.f32 %v742_v22, %v1114_v16  ;;  %v194_v51 = vmul.f32 %v741_v56, %v1104_v4 }
  0x53   :  { %v710_v36 = vadd.f32 %v678_v63, %v612_v35  ;;  %v516_v42 = vadd.f32 %v484_v34, %v419_v41  ;;  %v322_v54 = vadd.f32 %v290_v40, %v225_v33  ;;  %v291_v59 = vmul.f32 %v838_v49, %v1108_v8 }
  0x54   :  { %v129_v55 = vadd.f32 %v97_v46, %v1100_v2  ;;  %935 = vst [vmem:[#allocation8 + $0x30] sm:$0xff] %v903_v48  ;;  %v776_v60 = vmul.f32 %v1123_v26, %v743_v45  ;;  %v873_v47 = vmul.f32 %v1125_v27, %v840_v53  ;;  %v582_v61 = vmul.f32 %v839_v23, %v1116_v17 }
  0x55   :  { %v807_v52 = vadd.f32 %v775_v21, %v710_v36  ;;  %v613_v62 = vadd.f32 %v581_v28, %v516_v42  ;;  %v420_v57 = vadd.f32 %v388_v43, %v322_v54  ;;  %v389_v0 = vmul.f32 %v646_v38, %v1110_v10  ;;  %v745_v28 = vld [vmem:[#allocation7 + $0xa9] sm:$0xff] }
  0x56   :  { %v226_v56 = vadd.f32 %v194_v51, %v129_v55  ;;  %v680_v5 = vmul.f32 %v1118_v18, %v647_v50  ;;  %v98_v6 = vmul.f32 %v645_v9, %v1102_v3  ;;  %v195_v49 = vmul.f32 %v742_v22, %v1104_v4  ;;  %v649_v42 = vld [vmem:[#allocation7 + $0xb0] sm:$0xff] }
  0x57   :  { %v904_v1 = vadd.f32 %v872_v19, %v807_v52  ;;  %v711_v7 = vadd.f32 %v679_v37, %v613_v62  ;;  %v517_v13 = vadd.f32 %v485_v44, %v420_v57  ;;  %v486_v63 = vmul.f32 %v743_v45, %v1114_v16 }
  0x58   :  { %v323_v15 = vadd.f32 %v291_v59, %v226_v56  ;;  %v777_v12 = vmul.f32 %v1123_v26, %v744_v58  ;;  %v874_v20 = vmul.f32 %v1125_v27, %v841_v14  ;;  %v130_v24 = vadd.f32 %v98_v6, %v1100_v2 }
  0x59   :  { %936 = vst [vmem:[#allocation8 + $0x38] sm:$0xff] %v904_v1  ;;  %v292_v29 = vmul.f32 %v839_v23, %v1108_v8  ;;  %v808_v30 = vadd.f32 %v776_v60, %v711_v7  ;;  %v614_v9 = vadd.f32 %v582_v61, %v517_v13  ;;  %v583_v22 = vmul.f32 %v840_v53, %v1116_v17  ;;  %v842_v23 = vld [vmem:[#allocation7 + $0xaa] sm:$0xff]  ;;  %v843_v1 = vld [vmem:[#allocation7 + $0xb2] sm:$0xff] }
  0x5a   :  { %v421_v31 = vadd.f32 %v389_v0, %v323_v15  ;;  %v681_v21 = vmul.f32 %v1118_v18, %v648_v11  ;;  %v227_v19 = vadd.f32 %v195_v49, %v130_v24  ;;  %v390_v32 = vmul.f32 %v647_v50, %v1110_v10  ;;  %v650_v15 = vld [vmem:[#allocation7 + $0xc0] sm:$0xff] }
  0x5b   :  { %v99_v34 = vmul.f32 %v646_v38, %v1102_v3  ;;  %v905_v39 = vadd.f32 %v873_v47, %v808_v30  ;;  %v712_v40 = vadd.f32 %v680_v5, %v614_v9  ;;  %v196_v35 = vmul.f32 %v743_v45, %v1104_v4  ;;  %v746_v47 = vld [vmem:[#allocation7 + $0xb1] sm:$0xff]  ;;  %v747_v30 = vld [vmem:[#allocation7 + $0xc1] sm:$0xff] }
  0x5c   :  { %v518_v25 = vadd.f32 %v486_v63, %v421_v31  ;;  %v324_v37 = vadd.f32 %v292_v29, %v227_v19  ;;  %v487_v41 = vmul.f32 %v744_v58, %v1114_v16  ;;  %v293_v43 = vmul.f32 %v840_v53, %v1108_v8  ;;  %v844_v9 = vld [vmem:[#allocation7 + $0xc2] sm:$0xff] }
  0x5d   :  { %v131_v33 = vadd.f32 %v99_v34, %v1100_v2  ;;  %937 = vst [vmem:[#allocation8 + $0x40] sm:$0xff] %v905_v39  ;;  %v809_v46 = vadd.f32 %v777_v12, %v712_v40  ;;  %v778_v36 = vmul.f32 %v1123_v26, %v745_v28  ;;  %v875_v38 = vmul.f32 %v1125_v27, %v842_v23  ;;  %v651_v40 = vld [vmem:[#allocation7 + $0xc8] sm:$0xff] }
  0x5e   :  { %v615_v48 = vadd.f32 %v583_v22, %v518_v25  ;;  %v422_v44 = vadd.f32 %v390_v32, %v324_v37  ;;  %v584_v51 = vmul.f32 %v841_v14, %v1116_v17  ;;  %v391_v54 = vmul.f32 %v648_v11, %v1110_v10 }
  0x5f   :  { %v228_v45 = vadd.f32 %v196_v35, %v131_v33  ;;  %v906_v55 = vadd.f32 %v874_v20, %v809_v46  ;;  %v682_v52 = vmul.f32 %v1118_v18, %v649_v42  ;;  %v100_v53 = vmul.f32 %v647_v50, %v1102_v3  ;;  %v748_v46 = vld [vmem:[#allocation7 + $0xc9] sm:$0xff] }
  0x60   :  { %v713_v59 = vadd.f32 %v681_v21, %v615_v48  ;;  %v519_v60 = vadd.f32 %v487_v41, %v422_v44  ;;  %v488_v62 = vmul.f32 %v745_v28, %v1114_v16  ;;  %v197_v57 = vmul.f32 %v744_v58, %v1104_v4 }
  0x61   :  { %v325_v61 = vadd.f32 %v293_v43, %v228_v45  ;;  %938 = vst [vmem:[#allocation8 + $0x48] sm:$0xff] %v906_v55  ;;  %v779_v0 = vmul.f32 %v1123_v26, %v746_v47  ;;  %v132_v5 = vadd.f32 %v100_v53, %v1100_v2  ;;  %v294_v6 = vmul.f32 %v841_v14, %v1108_v8 }
  0x62   :  { %v810_v56 = vadd.f32 %v778_v36, %v713_v59  ;;  %v616_v49 = vadd.f32 %v584_v51, %v519_v60  ;;  %v876_v7 = vmul.f32 %v1125_v27, %v843_v1  ;;  %v585_v13 = vmul.f32 %v842_v23, %v1116_v17  ;;  %v652_v59 = vld [vmem:[#allocation7 + $0xd8] sm:$0xff] }
  0x63   :  { %v423_v50 = vadd.f32 %v391_v54, %v325_v61  ;;  %v683_v12 = vmul.f32 %v1118_v18, %v650_v15  ;;  %v229_v58 = vadd.f32 %v197_v57, %v132_v5  ;;  %v392_v20 = vmul.f32 %v649_v42, %v1110_v10  ;;  %v845_v54 = vld [vmem:[#allocation7 + $0xca] sm:$0xff] }
  0x64   :  { %v907_v63 = vadd.f32 %v875_v38, %v810_v56  ;;  %v714_v24 = vadd.f32 %v682_v52, %v616_v49  ;;  %v101_v31 = vmul.f32 %v648_v11, %v1102_v3  ;;  %v198_v14 = vmul.f32 %v745_v28, %v1104_v4 }
  0x65   :  { %v520_v29 = vadd.f32 %v488_v62, %v423_v50  ;;  %v780_v22 = vmul.f32 %v1123_v26, %v747_v30  ;;  %v877_v21 = vmul.f32 %v1125_v27, %v844_v9  ;;  %v326_v19 = vadd.f32 %v294_v6, %v229_v58 }
  0x66   :  { %939 = vst [vmem:[#allocation8 + $0x50] sm:$0xff] %v907_v63  ;;  %v489_v32 = vmul.f32 %v746_v47, %v1114_v16  ;;  %v811_v34 = vadd.f32 %v779_v0, %v714_v24  ;;  %v133_v25 = vadd.f32 %v101_v31, %v1100_v2  ;;  %v295_v35 = vmul.f32 %v842_v23, %v1108_v8  ;;  %v749_v0 = vld [vmem:[#allocation7 + $0xd9] sm:$0xff] }
  0x67   :  { %v617_v39 = vadd.f32 %v585_v13, %v520_v29  ;;  %v424_v37 = vadd.f32 %v392_v20, %v326_v19  ;;  %v586_v11 = vmul.f32 %v843_v1, %v1116_v17  ;;  %v684_v28 = vmul.f32 %v1118_v18, %v651_v40  ;;  %v653_v29 = vld [vmem:[#allocation7 + $0xe0] sm:$0xff] }
  0x68   :  { %v393_v41 = vmul.f32 %v650_v15, %v1110_v10  ;;  %v908_v33 = vadd.f32 %v876_v7, %v811_v34  ;;  %v230_v48 = vadd.f32 %v198_v14, %v133_v25  ;;  %v102_v36 = vmul.f32 %v649_v42, %v1102_v3  ;;  %v846_v7 = vld [vmem:[#allocation7 + $0xda] sm:$0xff]  ;;  %v847_v34 = vld [vmem:[#allocation7 + $0xe2] sm:$0xff] }
  0x69   :  { %v715_v43 = vadd.f32 %v683_v12, %v617_v39  ;;  %v521_v38 = vadd.f32 %v489_v32, %v424_v37  ;;  %v781_v44 = vmul.f32 %v1123_v26, %v748_v46  ;;  %v490_v51 = vmul.f32 %v747_v30, %v1114_v16  ;;  %v750_v32 = vld [vmem:[#allocation7 + $0xe1] sm:$0xff] }
  0x6a   :  { %v199_v23 = vmul.f32 %v746_v47, %v1104_v4  ;;  %940 = vst [vmem:[#allocation8 + $0x58] sm:$0xff] %v908_v33  ;;  %v327_v55 = vadd.f32 %v295_v35, %v230_v48  ;;  %v134_v52 = vadd.f32 %v102_v36, %v1100_v2  ;;  %v296_v53 = vmul.f32 %v843_v1, %v1108_v8 }
  0x6b   :  { %v812_v45 = vadd.f32 %v780_v22, %v715_v43  ;;  %v618_v60 = vadd.f32 %v586_v11, %v521_v38  ;;  %v878_v61 = vmul.f32 %v1125_v27, %v845_v54  ;;  %v587_v42 = vmul.f32 %v844_v9, %v1116_v17  ;;  %v654_v43 = vld [vmem:[#allocation7 + $0xf0] sm:$0xff] }
  0x6c   :  { %v685_v62 = vmul.f32 %v1118_v18, %v652_v59  ;;  %v425_v56 = vadd.f32 %v393_v41, %v327_v55  ;;  %v231_v47 = vadd.f32 %v199_v23, %v134_v52  ;;  %v394_v5 = vmul.f32 %v651_v40, %v1110_v10 }
  0x6d   :  { %v909_v57 = vadd.f32 %v877_v21, %v812_v45  ;;  %v716_v6 = vadd.f32 %v684_v28, %v618_v60  ;;  %v782_v49 = vmul.f32 %v1123_v26, %v749_v0  ;;  %v103_v50 = vmul.f32 %v650_v15, %v1102_v3 }
  0x6e   :  { %v200_v1 = vmul.f32 %v747_v30, %v1104_v4  ;;  %v522_v13 = vadd.f32 %v490_v51, %v425_v56  ;;  %v879_v63 = vmul.f32 %v1125_v27, %v846_v7  ;;  %v328_v12 = vadd.f32 %v296_v53, %v231_v47 }
  0x6f   :  { %941 = vst [vmem:[#allocation8 + $0x60] sm:$0xff] %v909_v57  ;;  %v491_v58 = vmul.f32 %v748_v46, %v1114_v16  ;;  %v813_v20 = vadd.f32 %v781_v44, %v716_v6  ;;  %v588_v24 = vmul.f32 %v845_v54, %v1116_v17  ;;  %v135_v31 = vadd.f32 %v103_v50, %v1100_v2 }
  0x70   :  { %v297_v14 = vmul.f32 %v844_v9, %v1108_v8  ;;  %v619_v22 = vadd.f32 %v587_v42, %v522_v13  ;;  %v426_v21 = vadd.f32 %v394_v5, %v328_v12  ;;  %v686_v15 = vmul.f32 %v1118_v18, %v653_v29  ;;  %v655_v13 = vld [vmem:[#allocation7 + $0xf8] sm:$0xff] }
  0x71   :  { %v395_v30 = vmul.f32 %v652_v59, %v1110_v10  ;;  %v910_v19 = vadd.f32 %v878_v61, %v813_v20  ;;  %v232_v39 = vadd.f32 %v200_v1, %v135_v31  ;;  %v104_v25 = vmul.f32 %v651_v40, %v1102_v3 }
  0x72   :  { %v201_v35 = vmul.f32 %v748_v46, %v1104_v4  ;;  %v717_v37 = vadd.f32 %v685_v62, %v619_v22  ;;  %v523_v11 = vadd.f32 %v491_v58, %v426_v21  ;;  %v783_v28 = vmul.f32 %v1123_v26, %v750_v32  ;;  %v848_v62 = vld [vmem:[#allocation7 + $0xf2] sm:$0xff]  ;;  %v849_v22 = vld [vmem:[#allocation7 + $0xfa] sm:$0xff] }
  0x73   :  { %v880_v9 = vmul.f32 %v1125_v27, %v847_v34  ;;  %942 = vst [vmem:[#allocation8 + $0x68] sm:$0xff] %v910_v19  ;;  %v329_v41 = vadd.f32 %v297_v14, %v232_v39  ;;  %v492_v33 = vmul.f32 %v749_v0, %v1114_v16  ;;  %v136_v48 = vadd.f32 %v104_v25, %v1100_v2  ;;  %v752_v14 = vld [vmem:[#allocation7 + $0xf9] sm:$0xff] }
  0x74   :  { %v298_v36 = vmul.f32 %v845_v54, %v1108_v8  ;;  %v814_v38 = vadd.f32 %v782_v49, %v717_v37  ;;  %v620_v44 = vadd.f32 %v588_v24, %v523_v11  ;;  %v589_v40 = vmul.f32 %v846_v7, %v1116_v17  ;;  %v751_v54 = vld [vmem:[#allocation7 + $0xf1] sm:$0xff]  ;;  %v656_v11 = vld [vmem:[#allocation7 + $0x108] sm:$0xff] }
  0x75   :  { %v687_v46 = vmul.f32 %v1118_v18, %v654_v43  ;;  %v427_v51 = vadd.f32 %v395_v30, %v329_v41  ;;  %v233_v23 = vadd.f32 %v201_v35, %v136_v48  ;;  %v396_v45 = vmul.f32 %v653_v29, %v1110_v10 }
  0x76   :  { %v105_v55 = vmul.f32 %v652_v59, %v1102_v3  ;;  %v911_v52 = vadd.f32 %v879_v63, %v814_v38  ;;  %v718_v53 = vadd.f32 %v686_v15, %v620_v44  ;;  %v493_v60 = vmul.f32 %v750_v32, %v1114_v16 }
  0x77   :  { %v202_v61 = vmul.f32 %v749_v0, %v1104_v4  ;;  %v524_v42 = vadd.f32 %v492_v33, %v427_v51  ;;  %v330_v57 = vadd.f32 %v298_v36, %v233_v23  ;;  %v299_v47 = vmul.f32 %v846_v7, %v1108_v8 }
  0x78   :  { %v137_v56 = vadd.f32 %v105_v55, %v1100_v2  ;;  %943 = vst [vmem:[#allocation8 + $0x70] sm:$0xff] %v911_v52  ;;  %v815_v5 = vadd.f32 %v783_v28, %v718_v53  ;;  %v784_v6 = vmul.f32 %v1123_v26, %v751_v54  ;;  %v881_v59 = vmul.f32 %v1125_v27, %v848_v62 }
  0x79   :  { %v590_v49 = vmul.f32 %v847_v34, %v1116_v17  ;;  %v621_v50 = vadd.f32 %v589_v40, %v524_v42  ;;  %v428_v1 = vadd.f32 %v396_v45, %v330_v57  ;;  %v397_v63 = vmul.f32 %v654_v43, %v1110_v10  ;;  %v753_v40 = vld [vmem:[#allocation7 + $0x109] sm:$0xff] }
  0x7a   :  { %v234_v0 = vadd.f32 %v202_v61, %v137_v56  ;;  %v912_v12 = vadd.f32 %v880_v9, %v815_v5  ;;  %v688_v58 = vmul.f32 %v1118_v18, %v655_v13  ;;  %v106_v20 = vmul.f32 %v653_v29, %v1102_v3  ;;  %v657_v42 = vld [vmem:[#allocation7 + $0x110] sm:$0xff] }
  0x7b   :  { %v203_v7 = vmul.f32 %v750_v32, %v1104_v4  ;;  %v719_v24 = vadd.f32 %v687_v46, %v621_v50  ;;  %v525_v31 = vadd.f32 %v493_v60, %v428_v1  ;;  %v494_v15 = vmul.f32 %v751_v54, %v1114_v16 }
  0x7c   :  { %v331_v21 = vadd.f32 %v299_v47, %v234_v0  ;;  %944 = vst [vmem:[#allocation8 + $0x78] sm:$0xff] %v912_v12  ;;  %v785_v30 = vmul.f32 %v1123_v26, %v752_v14  ;;  %v882_v19 = vmul.f32 %v1125_v27, %v849_v22  ;;  %v138_v39 = vadd.f32 %v106_v20, %v1100_v2  ;;  %v851_v12 = vld [vmem:[#allocation7 + $0x112] sm:$0xff] }
  0x7d   :  { %v300_v25 = vmul.f32 %v847_v34, %v1108_v8  ;;  %v816_v35 = vadd.f32 %v784_v6, %v719_v24  ;;  %v622_v29 = vadd.f32 %v590_v49, %v525_v31  ;;  %v591_v32 = vmul.f32 %v848_v62, %v1116_v17  ;;  %v850_v34 = vld [vmem:[#allocation7 + $0x10a] sm:$0xff] }
  0x7e   :  { %v429_v37 = vadd.f32 %v397_v63, %v331_v21  ;;  %v689_v28 = vmul.f32 %v1118_v18, %v656_v11  ;;  %v235_v9 = vadd.f32 %v203_v7, %v138_v39  ;;  %v398_v41 = vmul.f32 %v655_v13, %v1110_v10  ;;  %v658_v21 = vld [vmem:[#allocation7 + $0x120] sm:$0xff] }
  0x7f   :  { %v107_v33 = vmul.f32 %v654_v43, %v1102_v3  ;;  %v913_v48 = vadd.f32 %v881_v59, %v816_v35  ;;  %v720_v36 = vadd.f32 %v688_v58, %v622_v29  ;;  %v204_v44 = vmul.f32 %v751_v54, %v1104_v4  ;;  %v754_v59 = vld [vmem:[#allocation7 + $0x111] sm:$0xff]  ;;  %v755_v35 = vld [vmem:[#allocation7 + $0x121] sm:$0xff] }
  0x80   :  { %v526_v38 = vadd.f32 %v494_v15, %v429_v37  ;;  %v332_v46 = vadd.f32 %v300_v25, %v235_v9  ;;  %v495_v51 = vmul.f32 %v752_v14, %v1114_v16  ;;  %v301_v45 = vmul.f32 %v848_v62, %v1108_v8  ;;  %v852_v29 = vld [vmem:[#allocation7 + $0x122] sm:$0xff] }
  0x81   :  { %v139_v23 = vadd.f32 %v107_v33, %v1100_v2  ;;  %945 = vst [vmem:[#allocation8 + $0x80] sm:$0xff] %v913_v48  ;;  %v817_v55 = vadd.f32 %v785_v30, %v720_v36  ;;  %v786_v53 = vmul.f32 %v1123_v26, %v753_v40  ;;  %v883_v43 = vmul.f32 %v1125_v27, %v850_v34  ;;  %v659_v36 = vld [vmem:[#allocation7 + $0x128] sm:$0xff] }
  0x82   :  { %v623_v52 = vadd.f32 %v591_v32, %v526_v38  ;;  %v430_v60 = vadd.f32 %v398_v41, %v332_v46  ;;  %v592_v61 = vmul.f32 %v849_v22, %v1116_v17  ;;  %v399_v57 = vmul.f32 %v656_v11, %v1110_v10 }
  0x83   :  { %v236_v54 = vadd.f32 %v204_v44, %v139_v23  ;;  %v914_v56 = vadd.f32 %v882_v19, %v817_v55  ;;  %v690_v5 = vmul.f32 %v1118_v18, %v657_v42  ;;  %v108_v62 = vmul.f32 %v655_v13, %v1102_v3  ;;  %v756_v55 = vld [vmem:[#allocation7 + $0x129] sm:$0xff] }
  0x84   :  { %v721_v47 = vadd.f32 %v689_v28, %v623_v52  ;;  %v527_v6 = vadd.f32 %v495_v51, %v430_v60  ;;  %v496_v50 = vmul.f32 %v753_v40, %v1114_v16  ;;  %v205_v1 = vmul.f32 %v752_v14, %v1104_v4 }
  0x85   :  { %v333_v49 = vadd.f32 %v301_v45, %v236_v54  ;;  %946 = vst [vmem:[#allocation8 + $0x88] sm:$0xff] %v914_v56  ;;  %v787_v63 = vmul.f32 %v1123_v26, %v754_v59  ;;  %v140_v58 = vadd.f32 %v108_v62, %v1100_v2  ;;  %v302_v20 = vmul.f32 %v849_v22, %v1108_v8 }
  0x86   :  { %v818_v0 = vadd.f32 %v786_v53, %v721_v47  ;;  %v624_v7 = vadd.f32 %v592_v61, %v527_v6  ;;  %v884_v24 = vmul.f32 %v1125_v27, %v851_v12  ;;  %v593_v31 = vmul.f32 %v850_v34, %v1116_v17  ;;  %v660_v47 = vld [vmem:[#allocation7 + $0x138] sm:$0xff] }
  0x87   :  { %v431_v13 = vadd.f32 %v399_v57, %v333_v49  ;;  %v691_v30 = vmul.f32 %v1118_v18, %v658_v21  ;;  %v237_v14 = vadd.f32 %v205_v1, %v140_v58  ;;  %v400_v19 = vmul.f32 %v657_v42, %v1110_v10  ;;  %v853_v57 = vld [vmem:[#allocation7 + $0x12a] sm:$0xff] }
  0x88   :  { %v915_v15 = vadd.f32 %v883_v43, %v818_v0  ;;  %v722_v39 = vadd.f32 %v690_v5, %v624_v7  ;;  %v109_v37 = vmul.f32 %v656_v11, %v1102_v3  ;;  %v206_v22 = vmul.f32 %v753_v40, %v1104_v4 }
  0x89   :  { %v528_v25 = vadd.f32 %v496_v50, %v431_v13  ;;  %v788_v32 = vmul.f32 %v1123_v26, %v755_v35  ;;  %v885_v28 = vmul.f32 %v1125_v27, %v852_v29  ;;  %v334_v9 = vadd.f32 %v302_v20, %v237_v14 }
  0x8a   :  { %947 = vst [vmem:[#allocation8 + $0x90] sm:$0xff] %v915_v15  ;;  %v497_v41 = vmul.f32 %v754_v59, %v1114_v16  ;;  %v819_v33 = vadd.f32 %v787_v63, %v722_v39  ;;  %v141_v38 = vadd.f32 %v109_v37, %v1100_v2  ;;  %v303_v44 = vmul.f32 %v850_v34, %v1108_v8  ;;  %v757_v63 = vld [vmem:[#allocation7 + $0x139] sm:$0xff] }
  0x8b   :  { %v625_v48 = vadd.f32 %v593_v31, %v528_v25  ;;  %v432_v46 = vadd.f32 %v400_v19, %v334_v9  ;;  %v594_v11 = vmul.f32 %v851_v12, %v1116_v17  ;;  %v692_v40 = vmul.f32 %v1118_v18, %v659_v36  ;;  %v661_v25 = vld [vmem:[#allocation7 + $0x140] sm:$0xff] }
  0x8c   :  { %v401_v51 = vmul.f32 %v658_v21, %v1110_v10  ;;  %v916_v23 = vadd.f32 %v884_v24, %v819_v33  ;;  %v238_v52 = vadd.f32 %v206_v22, %v141_v38  ;;  %v110_v53 = vmul.f32 %v657_v42, %v1102_v3  ;;  %v854_v24 = vld [vmem:[#allocation7 + $0x13a] sm:$0xff]  ;;  %v855_v33 = vld [vmem:[#allocation7 + $0x142] sm:$0xff] }
  0x8d   :  { %v723_v45 = vadd.f32 %v691_v30, %v625_v48  ;;  %v529_v43 = vadd.f32 %v497_v41, %v432_v46  ;;  %v789_v60 = vmul.f32 %v1123_v26, %v756_v55  ;;  %v498_v61 = vmul.f32 %v755_v35, %v1114_v16  ;;  %v758_v41 = vld [vmem:[#allocation7 + $0x141] sm:$0xff] }
  0x8e   :  { %v207_v34 = vmul.f32 %v754_v59, %v1104_v4  ;;  %948 = vst [vmem:[#allocation8 + $0x98] sm:$0xff] %v916_v23  ;;  %v335_v56 = vadd.f32 %v303_v44, %v238_v52  ;;  %v142_v5 = vadd.f32 %v110_v53, %v1100_v2  ;;  %v304_v62 = vmul.f32 %v851_v12, %v1108_v8 }
  0x8f   :  { %v820_v54 = vadd.f32 %v788_v32, %v723_v45  ;;  %v626_v6 = vadd.f32 %v594_v11, %v529_v43  ;;  %v886_v49 = vmul.f32 %v1125_v27, %v853_v57  ;;  %v595_v42 = vmul.f32 %v852_v29, %v1116_v17  ;;  %v662_v45 = vld [vmem:[#allocation7 + $0x150] sm:$0xff] }
  0x90   :  { %v693_v50 = vmul.f32 %v1118_v18, %v660_v47  ;;  %v433_v0 = vadd.f32 %v401_v51, %v335_v56  ;;  %v239_v59 = vadd.f32 %v207_v34, %v142_v5  ;;  %v402_v58 = vmul.f32 %v659_v36, %v1110_v10 }
  0x91   :  { %v917_v1 = vadd.f32 %v885_v28, %v820_v54  ;;  %v724_v20 = vadd.f32 %v692_v40, %v626_v6  ;;  %v790_v7 = vmul.f32 %v1123_v26, %v757_v63  ;;  %v111_v13 = vmul.f32 %v658_v21, %v1102_v3 }
  0x92   :  { %v208_v12 = vmul.f32 %v755_v35, %v1104_v4  ;;  %v530_v31 = vadd.f32 %v498_v61, %v433_v0  ;;  %v887_v15 = vmul.f32 %v1125_v27, %v854_v24  ;;  %v336_v30 = vadd.f32 %v304_v62, %v239_v59 }
  0x93   :  { %949 = vst [vmem:[#allocation8 + $0xa0] sm:$0xff] %v917_v1  ;;  %v499_v14 = vmul.f32 %v756_v55, %v1114_v16  ;;  %v821_v19 = vadd.f32 %v789_v60, %v724_v20  ;;  %v596_v39 = vmul.f32 %v853_v57, %v1116_v17  ;;  %v143_v37 = vadd.f32 %v111_v13, %v1100_v2 }
  0x94   :  { %v305_v22 = vmul.f32 %v852_v29, %v1108_v8  ;;  %v627_v32 = vadd.f32 %v595_v42, %v530_v31  ;;  %v434_v28 = vadd.f32 %v402_v58, %v336_v30  ;;  %v694_v21 = vmul.f32 %v1118_v18, %v661_v25  ;;  %v663_v31 = vld [vmem:[#allocation7 + $0x158] sm:$0xff] }
  0x95   :  { %v403_v35 = vmul.f32 %v660_v47, %v1110_v10  ;;  %v918_v9 = vadd.f32 %v886_v49, %v821_v19  ;;  %v240_v48 = vadd.f32 %v208_v12, %v143_v37  ;;  %v112_v38 = vmul.f32 %v659_v36, %v1102_v3 }
  0x96   :  { %v209_v44 = vmul.f32 %v756_v55, %v1104_v4  ;;  %v725_v46 = vadd.f32 %v693_v50, %v627_v32  ;;  %v531_v11 = vadd.f32 %v499_v14, %v434_v28  ;;  %v791_v40 = vmul.f32 %v1123_v26, %v758_v41  ;;  %v856_v50 = vld [vmem:[#allocation7 + $0x152] sm:$0xff]  ;;  %v857_v32 = vld [vmem:[#allocation7 + $0x15a] sm:$0xff] }
  0x97   :  { %v888_v29 = vmul.f32 %v1125_v27, %v855_v33  ;;  %950 = vst [vmem:[#allocation8 + $0xa8] sm:$0xff] %v918_v9  ;;  %v337_v51 = vadd.f32 %v305_v22, %v240_v48  ;;  %v500_v23 = vmul.f32 %v757_v63, %v1114_v16  ;;  %v144_v52 = vadd.f32 %v112_v38, %v1100_v2  ;;  %v760_v22 = vld [vmem:[#allocation7 + $0x159] sm:$0xff] }
  0x98   :  { %v306_v53 = vmul.f32 %v853_v57, %v1108_v8  ;;  %v822_v43 = vadd.f32 %v790_v7, %v725_v46  ;;  %v628_v60 = vadd.f32 %v596_v39, %v531_v11  ;;  %v597_v36 = vmul.f32 %v854_v24, %v1116_v17  ;;  %v759_v57 = vld [vmem:[#allocation7 + $0x151] sm:$0xff]  ;;  %v664_v11 = vld [vmem:[#allocation7 + $0x168] sm:$0xff] }
  0x99   :  { %v695_v55 = vmul.f32 %v1118_v18, %v662_v45  ;;  %v435_v61 = vadd.f32 %v403_v35, %v337_v51  ;;  %v241_v34 = vadd.f32 %v209_v44, %v144_v52  ;;  %v404_v54 = vmul.f32 %v661_v25, %v1110_v10 }
  0x9a   :  { %v113_v56 = vmul.f32 %v660_v47, %v1102_v3  ;;  %v919_v5 = vadd.f32 %v887_v15, %v822_v43  ;;  %v726_v62 = vadd.f32 %v694_v21, %v628_v60  ;;  %v501_v6 = vmul.f32 %v758_v41, %v1114_v16 }
  0x9b   :  { %v210_v49 = vmul.f32 %v757_v63, %v1104_v4  ;;  %v532_v42 = vadd.f32 %v500_v23, %v435_v61  ;;  %v338_v1 = vadd.f32 %v306_v53, %v241_v34  ;;  %v307_v59 = vmul.f32 %v854_v24, %v1108_v8 }
  0x9c   :  { %v145_v0 = vadd.f32 %v113_v56, %v1100_v2  ;;  %951 = vst [vmem:[#allocation8 + $0xb0] sm:$0xff] %v919_v5  ;;  %v823_v58 = vadd.f32 %v791_v40, %v726_v62  ;;  %v792_v20 = vmul.f32 %v1123_v26, %v759_v57  ;;  %v889_v47 = vmul.f32 %v1125_v27, %v856_v50 }
  0x9d   :  { %v598_v7 = vmul.f32 %v855_v33, %v1116_v17  ;;  %v629_v13 = vadd.f32 %v597_v36, %v532_v42  ;;  %v436_v12 = vadd.f32 %v404_v54, %v338_v1  ;;  %v405_v15 = vmul.f32 %v662_v45, %v1110_v10  ;;  %v761_v36 = vld [vmem:[#allocation7 + $0x169] sm:$0xff] }
  0x9e   :  { %v242_v63 = vadd.f32 %v210_v49, %v145_v0  ;;  %v920_v30 = vadd.f32 %v888_v29, %v823_v58  ;;  %v696_v14 = vmul.f32 %v1118_v18, %v663_v31  ;;  %v114_v19 = vmul.f32 %v661_v25, %v1102_v3  ;;  %v665_v42 = vld [vmem:[#allocation7 + $0x170] sm:$0xff] }
  0x9f   :  { %v211_v24 = vmul.f32 %v758_v41, %v1104_v4  ;;  %v727_v39 = vadd.f32 %v695_v55, %v629_v13  ;;  %v533_v37 = vadd.f32 %v501_v6, %v436_v12  ;;  %v502_v21 = vmul.f32 %v759_v57, %v1114_v16 }
  0xa0   :  { %v339_v28 = vadd.f32 %v307_v59, %v242_v63  ;;  %952 = vst [vmem:[#allocation8 + $0xb8] sm:$0xff] %v920_v30  ;;  %v793_v35 = vmul.f32 %v1123_v26, %v760_v22  ;;  %v890_v9 = vmul.f32 %v1125_v27, %v857_v32  ;;  %v146_v48 = vadd.f32 %v114_v19, %v1100_v2  ;;  %v859_v30 = vld [vmem:[#allocation7 + $0x172] sm:$0xff] }
  0xa1   :  { %v308_v38 = vmul.f32 %v855_v33, %v1108_v8  ;;  %v824_v44 = vadd.f32 %v792_v20, %v727_v39  ;;  %v630_v25 = vadd.f32 %v598_v7, %v533_v37  ;;  %v599_v41 = vmul.f32 %v856_v50, %v1116_v17  ;;  %v858_v33 = vld [vmem:[#allocation7 + $0x16a] sm:$0xff] }
  0xa2   :  { %v437_v46 = vadd.f32 %v405_v15, %v339_v28  ;;  %v697_v40 = vmul.f32 %v1118_v18, %v664_v11  ;;  %v243_v29 = vadd.f32 %v211_v24, %v146_v48  ;;  %v406_v51 = vmul.f32 %v663_v31, %v1110_v10  ;;  %v666_v28 = vld [vmem:[#allocation7 + $0x180] sm:$0xff] }
  0xa3   :  { %v115_v23 = vmul.f32 %v662_v45, %v1102_v3  ;;  %v921_v52 = vadd.f32 %v889_v47, %v824_v44  ;;  %v728_v53 = vadd.f32 %v696_v14, %v630_v25  ;;  %v212_v60 = vmul.f32 %v759_v57, %v1104_v4  ;;  %v762_v47 = vld [vmem:[#allocation7 + $0x171] sm:$0xff]  ;;  %v763_v44 = vld [vmem:[#allocation7 + $0x181] sm:$0xff] }
  0xa4   :  { %v534_v43 = vadd.f32 %v502_v21, %v437_v46  ;;  %v340_v55 = vadd.f32 %v308_v38, %v243_v29  ;;  %v503_v61 = vmul.f32 %v760_v22, %v1114_v16  ;;  %v309_v54 = vmul.f32 %v856_v50, %v1108_v8 }
  0xa5   :  { %v147_v34 = vadd.f32 %v115_v23, %v1100_v2  ;;  %953 = vst [vmem:[#allocation8 + $0xc0] sm:$0xff] %v921_v52  ;;  %v825_v56 = vadd.f32 %v793_v35, %v728_v53  ;;  %v794_v62 = vmul.f32 %v1123_v26, %v761_v36  ;;  %v891_v45 = vmul.f32 %v1125_v27, %v858_v33  ;;  %v860_v23 = vld [vmem:[#allocation7 + $0x182] sm:$0xff] }
  0xa6   :  { %v631_v5 = vadd.f32 %v599_v41, %v534_v43  ;;  %v438_v6 = vadd.f32 %v406_v51, %v340_v55  ;;  %v600_v49 = vmul.f32 %v857_v32, %v1116_v17  ;;  %v407_v1 = vmul.f32 %v664_v11, %v1110_v10 }
  0xa7   :  { %v244_v57 = vadd.f32 %v212_v60, %v147_v34  ;;  %v922_v0 = vadd.f32 %v890_v9, %v825_v56  ;;  %v698_v58 = vmul.f32 %v1118_v18, %v665_v42  ;;  %v116_v50 = vmul.f32 %v663_v31, %v1102_v3  ;;  %v667_v34 = vld [vmem:[#allocation7 + $0x188] sm:$0xff] }
  0xa8   :  { %v729_v59 = vadd.f32 %v697_v40, %v631_v5  ;;  %v535_v20 = vadd.f32 %v503_v61, %v438_v6  ;;  %v504_v13 = vmul.f32 %v761_v36, %v1114_v16  ;;  %v213_v12 = vmul.f32 %v760_v22, %v1104_v4 }
  0xa9   :  { %v341_v7 = vadd.f32 %v309_v54, %v244_v57  ;;  %954 = vst [vmem:[#allocation8 + $0xc8] sm:$0xff] %v922_v0  ;;  %v795_v15 = vmul.f32 %v1123_v26, %v762_v47  ;;  %v148_v14 = vadd.f32 %v116_v50, %v1100_v2  ;;  %v310_v19 = vmul.f32 %v857_v32, %v1108_v8 }
  0xaa   :  { %v826_v63 = vadd.f32 %v794_v62, %v729_v59  ;;  %v632_v24 = vadd.f32 %v600_v49, %v535_v20  ;;  %v892_v39 = vmul.f32 %v1125_v27, %v859_v30  ;;  %v601_v37 = vmul.f32 %v858_v33, %v1116_v17  ;;  %v764_v49 = vld [vmem:[#allocation7 + $0x189] sm:$0xff] }
  0xab   :  { %v439_v31 = vadd.f32 %v407_v1, %v341_v7  ;;  %v699_v35 = vmul.f32 %v1118_v18, %v666_v28  ;;  %v245_v22 = vadd.f32 %v213_v12, %v148_v14  ;;  %v408_v9 = vmul.f32 %v665_v42, %v1110_v10  ;;  %v861_v20 = vld [vmem:[#allocation7 + $0x18a] sm:$0xff] }
  0xac   :  { %v923_v21 = vadd.f32 %v891_v45, %v826_v63  ;;  %v730_v48 = vadd.f32 %v698_v58, %v632_v24  ;;  %v117_v25 = vmul.f32 %v664_v11, %v1102_v3  ;;  %v214_v32 = vmul.f32 %v761_v36, %v1104_v4  ;;  %v765_v63 = vld [vmem:[#allocation7 + $0x199] sm:$0xff] }
  0xad   :  { %v536_v38 = vadd.f32 %v504_v13, %v439_v31  ;;  %v796_v46 = vmul.f32 %v1123_v26, %v763_v44  ;;  %v342_v41 = vadd.f32 %v310_v19, %v245_v22  ;;  %v505_v40 = vmul.f32 %v762_v47, %v1114_v16  ;;  %v862_v19 = vld [vmem:[#allocation7 + $0x19a] sm:$0xff] }
  0xae   :  { %955 = vst [vmem:[#allocation8 + $0xd0] sm:$0xff] %v923_v21  ;;  %v827_v29 = vadd.f32 %v795_v15, %v730_v48  ;;  %v149_v52 = vadd.f32 %v117_v25, %v1100_v2  ;;  %v311_v53 = vmul.f32 %v858_v33, %v1108_v8  ;;  %v893_v43 = vmul.f32 %v1125_v27, %v860_v23  ;;  %v669_v24 = vld [vmem:[#allocation7 + $0x1a0] sm:$0xff] }
  0xaf   :  { %v633_v51 = vadd.f32 %v601_v37, %v536_v38  ;;  %v440_v60 = vadd.f32 %v408_v9, %v342_v41  ;;  %v602_v11 = vmul.f32 %v859_v30, %v1116_v17  ;;  %v409_v36 = vmul.f32 %v666_v28, %v1110_v10  ;;  %v766_v21 = vld [vmem:[#allocation7 + $0x1a1] sm:$0xff] }
  0xb0   :  { %v924_v55 = vadd.f32 %v892_v39, %v827_v29  ;;  %v246_v54 = vadd.f32 %v214_v32, %v149_v52  ;;  %v118_v56 = vmul.f32 %v665_v42, %v1102_v3  ;;  %v700_v62 = vmul.f32 %v1118_v18, %v667_v34  ;;  %v668_v42 = vld [vmem:[#allocation7 + $0x198] sm:$0xff]  ;;  %v863_v38 = vld [vmem:[#allocation7 + $0x1a2] sm:$0xff] }
  0xb1   :  { %v731_v61 = vadd.f32 %v699_v35, %v633_v51  ;;  %v537_v5 = vadd.f32 %v505_v40, %v440_v60  ;;  %v506_v45 = vmul.f32 %v763_v44, %v1114_v16  ;;  %v215_v33 = vmul.f32 %v762_v47, %v1104_v4 }
  0xb2   :  { %956 = vst [vmem:[#allocation8 + $0xd8] sm:$0xff] %v924_v55  ;;  %v343_v57 = vadd.f32 %v311_v53, %v246_v54  ;;  %v150_v1 = vadd.f32 %v118_v56, %v1100_v2  ;;  %v312_v0 = vmul.f32 %v859_v30, %v1108_v8  ;;  %v797_v58 = vmul.f32 %v1123_v26, %v764_v49 }
  0xb3   :  { %v828_v6 = vadd.f32 %v796_v46, %v731_v61  ;;  %v634_v59 = vadd.f32 %v602_v11, %v537_v5  ;;  %v603_v3 = vmul.f32 %v860_v23, %v1116_v17  ;;  %v410_v4 = vmul.f32 %v667_v34, %v1110_v10 }
  0xb4   :  { %v441_v7 = vadd.f32 %v409_v36, %v343_v57  ;;  %v247_v13 = vadd.f32 %v215_v33, %v150_v1  ;;  %v894_v12 = vmul.f32 %v1125_v27, %v861_v20  ;;  %v701_v8 = vmul.f32 %v1118_v18, %v668_v42 }
  0xb5   :  { %v925_v50 = vadd.f32 %v893_v43, %v828_v6  ;;  %v732_v47 = vadd.f32 %v700_v62, %v634_v59  ;;  %v507_v30 = vmul.f32 %v764_v49, %v1114_v16  ;;  %v798_v31 = vmul.f32 %v1123_v26, %v765_v63 }
  0xb6   :  { %v538_v2 = vadd.f32 %v506_v45, %v441_v7  ;;  %v344_v15 = vadd.f32 %v312_v0, %v247_v13  ;;  %v604_v10 = vmul.f32 %v861_v20, %v1116_v17  ;;  %v895_v22 = vmul.f32 %v1125_v27, %v862_v19 }
  0xb7   :  { %957 = vst [vmem:[#allocation8 + $0xe0] sm:$0xff] %v925_v50  ;;  %v829_v14 = vadd.f32 %v797_v58, %v732_v47  ;;  %v702_v48 = vmul.f32 %v1118_v18, %v669_v24  ;;  %v799_v25 = vmul.f32 %v1123_v26, %v766_v21  ;;  %v896_v41 = vmul.f32 %v1125_v27, %v863_v38 }
  0xb8   :  { %v635_v39 = vadd.f32 %v603_v3, %v538_v2  ;;  %v442_v37 = vadd.f32 %v410_v4, %v344_v15 }
  0xb9   :  { %v926_v28 = vadd.f32 %v894_v12, %v829_v14 }
  0xba   :  { %v733_v35 = vadd.f32 %v701_v8, %v635_v39  ;;  %v539_v9 = vadd.f32 %v507_v30, %v442_v37 }
  0xbb   :  { %958 = vst [vmem:[#allocation8 + $0xe8] sm:$0xff] %v926_v28 }
  0xbc   :  { %v830_v16 = vadd.f32 %v798_v31, %v733_v35  ;;  %v636_v44 = vadd.f32 %v604_v10, %v539_v9 }
  0xbe   :  { %v927_v32 = vadd.f32 %v895_v22, %v830_v16  ;;  %v734_v46 = vadd.f32 %v702_v48, %v636_v44 }
  0xc0   :  { %959 = vst [vmem:[#allocation8 + $0xf0] sm:$0xff] %v927_v32  ;;  %v831_v17 = vadd.f32 %v799_v25, %v734_v46 }
  0xc2   :  { %v928_v40 = vadd.f32 %v896_v41, %v831_v17 }
  0xc4   :  { %960 = vst [vmem:[#allocation8 + $0xf8] sm:$0xff] %v928_v40 }
  0xc5   :  { %1037 = shalt.err (!%p1034_p3)
}
  0xc6   :  { %s1038_s17 = scalar_lea.hbm %s1458_s3, 4096 }
  0xc7   :  { %p1039_p4 = scmp.ne.s32.totalorder %s1458_s3, %s1038_s17  ;;  %p1042_p5 = scmp.lt.u32.totalorder %s1038_s17, %s1458_s3 }
  0xc9   :  { %p1044_p6 = pnand %p1042_p5, %p1039_p4 }
  0xcb   :  { %1047 = shalt.err (!%p1044_p6)
}
  0xcc   :  { %972 = dma.vmem_to_hbm [thread:$0]  %s967_s2, 4096, %s1458_s3, [#allocation5], %s1056_s26, %s1056_s26, %s1057_s27  }
  0xcd   :  { %1052 = dma.done.wait [#allocation5], 4096  }
  0xce   :  { %1053 = vsyncadd [#allocation5], 4294963200 }
  0xcf   :  { %976 = vsyncpa [#allocation4], 1 }
  0xd0   :  { %977 = vsyncpa [#allocation5], 1 }
  0xd1   :  { %978 = vsyncpa [#allocation6], 1 }

</bundles_post_ra>
